<compile_context>
chip_gen: v7x
topology: tpu7x:2x2x1
jax: 0.10.0
libtpu: 0.0.40
codegen_flags: <defaults>
</compile_context>

<pallas_src>
import functools

import jax
import jax.numpy as jnp
from jax.experimental import pallas as pl
from jax.experimental.pallas import tpu as pltpu

HIDDEN = 256


def dqn2_kernel(x_ref, w1_ref, w2_ref, w3_ref, w4_ref, b123_ref, b4_ref, o_ref):
    """Fused 4-layer MLP on one batch tile resident in VMEM.

    Matmuls run on the MXU in the weights' dtype (bf16 by default) with f32
    accumulation; the bias-add + ReLU epilogue runs in b123_ref.dtype (bf16 on
    chips with a bf16 VPU, f32 on v5e).  The final bias add stays f32.
    """
    cdt = w1_ref.dtype    # MXU operand dtype (bf16 by default)
    edt = b123_ref.dtype  # epilogue (bias add / ReLU) dtype

    h = x_ref[...].astype(cdt)
    a = jnp.dot(h, w1_ref[...], preferred_element_type=jnp.float32)
    h = jnp.maximum(a.astype(edt) + b123_ref[0:1, :], 0).astype(cdt)

    a = jnp.dot(h, w2_ref[...], preferred_element_type=jnp.float32)
    h = jnp.maximum(a.astype(edt) + b123_ref[1:2, :], 0).astype(cdt)

    a = jnp.dot(h, w3_ref[...], preferred_element_type=jnp.float32)
    h = jnp.maximum(a.astype(edt) + b123_ref[2:3, :], 0).astype(cdt)

    out = jnp.dot(h, w4_ref[...], preferred_element_type=jnp.float32) + b4_ref[...]
    o_ref[...] = out.astype(o_ref.dtype)


def _round_up(x, m):
    return ((x + m - 1) // m) * m


@functools.lru_cache(maxsize=1)
def _tpu_defaults():
    """(mxu_m, tensorcores_per_chip, has_bf16_vpu) for the local TPU."""
    try:
        kind = jax.devices()[0].device_kind.lower()
    except Exception:  # pragma: no cover - defensive
        kind = ""
    if "v5e" in kind or "v5 lite" in kind or "v5lite" in kind:
        return 128, 1, False   # v5e: 128-wide MXU, 1 TC, no bf16 VPU
    if "7" in kind:
        return 256, 2, True    # v7x: 256-wide MXU, 2 TCs/chip, bf16 VPU
    return 256, 1, True        # v6e / default


def _default_tile_b(batch, *, mxu_m, num_cores):
    """Batch tile: multiple of 8 (sublane), capped at the MXU M dim, and for
    multi-TensorCore chips split evenly so the 'parallel' batch axis has no
    straggler core (e.g. B=384 on v7x -> 192, not 256+128)."""
    per_core = -(-batch // num_cores) if batch > mxu_m else batch
    return max(8, min(_round_up(per_core, 8), mxu_m))


def prepare_params(params, *, weight_dtype=jnp.bfloat16, epilogue_dtype=None):
    """One-time weight prep, hoisted out of the per-call forward:
      * weights cast to the MXU-native dtype (bf16),
      * b1..b3 packed into a single [3, HIDDEN] array in the epilogue dtype
        (fewer pallas_call inputs -> fewer DMA descriptors),
      * b4 kept f32 (final accumulate stays full precision).
    """
    if epilogue_dtype is None:
        _, _, bf16_vpu = _tpu_defaults()
        epilogue_dtype = jnp.bfloat16 if bf16_vpu else jnp.float32
    return {
        "w1": params["w1"].astype(weight_dtype),
        "w2": params["w2"].astype(weight_dtype),
        "w3": params["w3"].astype(weight_dtype),
        "w4": params["w4"].astype(weight_dtype),
        "b123": jnp.concatenate(
            [params["b1"], params["b2"], params["b3"]], axis=0
        ).astype(epilogue_dtype),
        "b4": params["b4"].astype(jnp.float32),
    }


@jax.jit
def dqn2_forward(x, prepared):
    """x: [B, input_dim] f32; prepared: output of prepare_params().
    Returns [B, output_dim] f32 Q-values."""
    B, in_dim = x.shape
    out_dim = prepared["w4"].shape[1]
    mxu_m, num_cores, _ = _tpu_defaults()
    tile_b = _default_tile_b(B, mxu_m=mxu_m, num_cores=num_cores)
    grid = (pl.cdiv(B, tile_b),)

    # Weights/biases are grid-invariant (constant index_map): fetched once and
    # reused across batch tiles. Only x and the output are tiled over batch.
    def full2d(arr):
        return pl.BlockSpec(arr.shape, lambda i: (0, 0))

    in_specs = [
        pl.BlockSpec((tile_b, in_dim), lambda i: (i, 0)),  # x
        full2d(prepared["w1"]), full2d(prepared["w2"]),
        full2d(prepared["w3"]), full2d(prepared["w4"]),
        full2d(prepared["b123"]), full2d(prepared["b4"]),
    ]
    # Output stays at the true action width (out_dim): at width 8 the masked
    # store penalty is negligible and this avoids 16x inflated HBM writeback
    # plus a wrapper slice op.
    out_spec = pl.BlockSpec((tile_b, out_dim), lambda i: (i, 0))

    flops = 2 * B * (in_dim * HIDDEN + 2 * HIDDEN * HIDDEN + HIDDEN * out_dim)
    bytes_accessed = (
        x.size * x.dtype.itemsize
        + sum(int(a.size) * a.dtype.itemsize for a in prepared.values())
        + B * out_dim * 4
    )

    return pl.pallas_call(
        dqn2_kernel,
        out_shape=jax.ShapeDtypeStruct((B, out_dim), jnp.float32),
        grid_spec=pltpu.PrefetchScalarGridSpec(
            num_scalar_prefetch=0,
            grid=grid,
            in_specs=in_specs,
            out_specs=out_spec,
        ),
        compiler_params=pltpu.CompilerParams(
            dimension_semantics=("parallel",)),
        cost_estimate=pl.CostEstimate(
            flops=flops, transcendentals=0, bytes_accessed=bytes_accessed),
    )(x, prepared["w1"], prepared["w2"], prepared["w3"], prepared["w4"],
      prepared["b123"], prepared["b4"])


def init_params(key, input_dim, output_dim):
    """Deterministic init mirroring nn.Linear's uniform(-1/sqrt(fan_in), ...)
    scheme, stored as [in, out] matrices (PyTorch weight transposed)."""
    dims = [(input_dim, HIDDEN), (HIDDEN, HIDDEN), (HIDDEN, HIDDEN),
            (HIDDEN, output_dim)]
    params = {}
    keys = jax.random.split(key, 2 * len(dims))
    for idx, (fan_in, fan_out) in enumerate(dims):
        bound = 1.0 / jnp.sqrt(jnp.float32(fan_in))
        w = jax.random.uniform(keys[2 * idx], (fan_in, fan_out),
                               jnp.float32, -bound, bound)
        b = jax.random.uniform(keys[2 * idx + 1], (1, fan_out),
                               jnp.float32, -bound, bound)
        params[f"w{idx + 1}"] = w
        params[f"b{idx + 1}"] = b
    return params


def reference_forward(x, params):
    h = jnp.maximum(x @ params["w1"] + params["b1"], 0.0)
    h = jnp.maximum(h @ params["w2"] + params["b2"], 0.0)
    h = jnp.maximum(h @ params["w3"] + params["b3"], 0.0)
    return h @ params["w4"] + params["b4"]


if __name__ == "__main__":
    key = jax.random.PRNGKey(0)
    k_x, k_p, k_x2 = jax.random.split(key, 3)

    input_dim = 32    # state vector size
    output_dim = 8    # number of discrete actions
    params = init_params(k_p, input_dim, output_dim)
    prepared = prepare_params(params)   # one-time cast/pack (hoisted)

    # Case 1: tiny action-selection batch (B=8) -> single 8-row tile.
    x_small = jax.random.normal(k_x, (8, input_dim), jnp.float32)
    out_small = jax.block_until_ready(dqn2_forward(x_small, prepared))
    ref_small = reference_forward(x_small, params)
    assert out_small.shape == (8, output_dim)
    # bf16 weights/MXU operands + bf16 epilogue with f32 accumulation ->
    # loosened tolerance.
    assert jnp.allclose(out_small, ref_small, atol=5e-2, rtol=5e-2)

    # Case 2: replay-style batch (B=384) -> multiple batch tiles (192x2 on
    # v7x, 256+partial elsewhere); exercises the pipelined grid and the
    # batch-edge masking of the partial tile.
    x_big = jax.random.normal(k_x2, (384, input_dim), jnp.float32)
    out_big = jax.block_until_ready(dqn2_forward(x_big, prepared))
    ref_big = reference_forward(x_big, params)
    assert out_big.shape == (384, output_dim)
    assert jnp.allclose(out_big, ref_big, atol=5e-2, rtol=5e-2)

    print("KERNEL_OK")
</pallas_src>

<mosaic_0001>
module attributes {stable_mosaic.version = 11 : i64} {
  func.func @dqn2_kernel(%arg0: i32, %arg1: memref<8x32xf32, #tpu.memory_space<vmem>>, %arg2: memref<32x256xbf16, #tpu.memory_space<vmem>>, %arg3: memref<256x256xbf16, #tpu.memory_space<vmem>>, %arg4: memref<256x256xbf16, #tpu.memory_space<vmem>>, %arg5: memref<256x8xbf16, #tpu.memory_space<vmem>>, %arg6: memref<3x256xbf16, #tpu.memory_space<vmem>>, %arg7: memref<1x8xf32, #tpu.memory_space<vmem>>, %arg8: memref<8x8xf32, #tpu.memory_space<vmem>>) attributes {dimension_semantics = [#tpu.dimension_semantics<parallel>], iteration_bounds = array<i64: 1>, scalar_prefetch = 0 : i64, scratch_operands = 0 : i64, tpu.core_type = #tpu.core_type<tc>, window_params = [{transform_indices = @transform_0, window_bounds = array<i64: 8, 32>}, {pipeline_mode = #tpu.pipeline_mode<synchronous>, transform_indices = @transform_1, window_bounds = array<i64: 32, 256>}, {pipeline_mode = #tpu.pipeline_mode<synchronous>, transform_indices = @transform_2, window_bounds = array<i64: 256, 256>}, {pipeline_mode = #tpu.pipeline_mode<synchronous>, transform_indices = @transform_3, window_bounds = array<i64: 256, 256>}, {pipeline_mode = #tpu.pipeline_mode<synchronous>, transform_indices = @transform_4, window_bounds = array<i64: 256, 8>}, {pipeline_mode = #tpu.pipeline_mode<synchronous>, transform_indices = @transform_5, window_bounds = array<i64: 3, 256>}, {pipeline_mode = #tpu.pipeline_mode<synchronous>, transform_indices = @transform_6, window_bounds = array<i64: 1, 8>}, {transform_indices = @transform_7, window_bounds = array<i64: 8, 8>}]} {
    %c0 = arith.constant 0 : index
    %c0_0 = arith.constant 0 : index
    %0 = vector.load %arg1[%c0, %c0_0] : memref<8x32xf32, #tpu.memory_space<vmem>>, vector<8x32xf32>
    %1 = arith.truncf %0 : vector<8x32xf32> to vector<8x32xbf16>
    %c0_1 = arith.constant 0 : index
    %c0_2 = arith.constant 0 : index
    %2 = vector.load %arg2[%c0_1, %c0_2] : memref<32x256xbf16, #tpu.memory_space<vmem>>, vector<32x256xbf16>
    %cst = arith.constant dense<0.000000e+00> : vector<8x256xf32>
    %3 = tpu.matmul %1, %2, %cst {dimension_numbers = #tpu.dot_dimension_numbers<[1], [0], [0], [1], [0, 0, 1, 1], [], []>} : vector<8x32xbf16>, vector<32x256xbf16>, vector<8x256xf32> -> vector<8x256xf32>
    %4 = arith.truncf %3 : vector<8x256xf32> to vector<8x256xbf16>
    %c0_3 = arith.constant 0 : index
    %c0_4 = arith.constant 0 : index
    %5 = vector.load %arg6[%c0_3, %c0_4] : memref<3x256xbf16, #tpu.memory_space<vmem>>, vector<1x256xbf16>
    %6 = vector.broadcast %5 : vector<1x256xbf16> to vector<8x256xbf16>
    %7 = arith.addf %4, %6 : vector<8x256xbf16>
    %cst_5 = arith.constant 0.000000e+00 : bf16
    %8 = vector.broadcast %cst_5 : bf16 to vector<8x256xbf16>
    %9 = arith.maximumf %7, %8 : vector<8x256xbf16>
    %c0_6 = arith.constant 0 : index
    %c0_7 = arith.constant 0 : index
    %10 = vector.load %arg3[%c0_6, %c0_7] : memref<256x256xbf16, #tpu.memory_space<vmem>>, vector<256x256xbf16>
    %cst_8 = arith.constant dense<0.000000e+00> : vector<8x256xf32>
    %11 = tpu.matmul %9, %10, %cst_8 {dimension_numbers = #tpu.dot_dimension_numbers<[1], [0], [0], [1], [0, 0, 1, 1], [], []>} : vector<8x256xbf16>, vector<256x256xbf16>, vector<8x256xf32> -> vector<8x256xf32>
    %12 = arith.truncf %11 : vector<8x256xf32> to vector<8x256xbf16>
    %c1 = arith.constant 1 : index
    %c0_9 = arith.constant 0 : index
    %13 = vector.load %arg6[%c1, %c0_9] : memref<3x256xbf16, #tpu.memory_space<vmem>>, vector<1x256xbf16>
    %14 = vector.broadcast %13 : vector<1x256xbf16> to vector<8x256xbf16>
    %15 = arith.addf %12, %14 : vector<8x256xbf16>
    %cst_10 = arith.constant 0.000000e+00 : bf16
    %16 = vector.broadcast %cst_10 : bf16 to vector<8x256xbf16>
    %17 = arith.maximumf %15, %16 : vector<8x256xbf16>
    %c0_11 = arith.constant 0 : index
    %c0_12 = arith.constant 0 : index
    %18 = vector.load %arg4[%c0_11, %c0_12] : memref<256x256xbf16, #tpu.memory_space<vmem>>, vector<256x256xbf16>
    %cst_13 = arith.constant dense<0.000000e+00> : vector<8x256xf32>
    %19 = tpu.matmul %17, %18, %cst_13 {dimension_numbers = #tpu.dot_dimension_numbers<[1], [0], [0], [1], [0, 0, 1, 1], [], []>} : vector<8x256xbf16>, vector<256x256xbf16>, vector<8x256xf32> -> vector<8x256xf32>
    %20 = arith.truncf %19 : vector<8x256xf32> to vector<8x256xbf16>
    %c2 = arith.constant 2 : index
    %c0_14 = arith.constant 0 : index
    %21 = vector.load %arg6[%c2, %c0_14] : memref<3x256xbf16, #tpu.memory_space<vmem>>, vector<1x256xbf16>
    %22 = vector.broadcast %21 : vector<1x256xbf16> to vector<8x256xbf16>
    %23 = arith.addf %20, %22 : vector<8x256xbf16>
    %cst_15 = arith.constant 0.000000e+00 : bf16
    %24 = vector.broadcast %cst_15 : bf16 to vector<8x256xbf16>
    %25 = arith.maximumf %23, %24 : vector<8x256xbf16>
    %c0_16 = arith.constant 0 : index
    %c0_17 = arith.constant 0 : index
    %26 = vector.load %arg5[%c0_16, %c0_17] : memref<256x8xbf16, #tpu.memory_space<vmem>>, vector<256x8xbf16>
    %cst_18 = arith.constant dense<0.000000e+00> : vector<8x8xf32>
    %27 = tpu.matmul %25, %26, %cst_18 {dimension_numbers = #tpu.dot_dimension_numbers<[1], [0], [0], [1], [0, 0, 1, 1], [], []>} : vector<8x256xbf16>, vector<256x8xbf16>, vector<8x8xf32> -> vector<8x8xf32>
    %c0_19 = arith.constant 0 : index
    %c0_20 = arith.constant 0 : index
    %28 = vector.load %arg7[%c0_19, %c0_20] : memref<1x8xf32, #tpu.memory_space<vmem>>, vector<1x8xf32>
    %29 = vector.broadcast %28 : vector<1x8xf32> to vector<8x8xf32>
    %30 = arith.addf %27, %29 : vector<8x8xf32>
    %c0_21 = arith.constant 0 : index
    %c0_22 = arith.constant 0 : index
    %31 = vector.load %arg8[%c0_21, %c0_22] : memref<8x8xf32, #tpu.memory_space<vmem>>, vector<8x8xf32>
    tpu.vector_store %arg8[%c0_21, %c0_22], %30 {strides = array<i32>} : memref<8x8xf32, #tpu.memory_space<vmem>>, vector<8x8xf32>,
    return
  }
  func.func @transform_0(%arg0: i32) -> (i32, i32) {
    %c0_i32 = arith.constant 0 : i32
    %c0_i32_0 = arith.constant 0 : i32
    return %arg0, %c0_i32 : i32, i32
  }
  func.func @transform_1(%arg0: i32) -> (i32, i32) {
    %c0_i32 = arith.constant 0 : i32
    %c0_i32_0 = arith.constant 0 : i32
    %c0_i32_1 = arith.constant 0 : i32
    return %c0_i32, %c0_i32_0 : i32, i32
  }
  func.func @transform_2(%arg0: i32) -> (i32, i32) {
    %c0_i32 = arith.constant 0 : i32
    %c0_i32_0 = arith.constant 0 : i32
    %c0_i32_1 = arith.constant 0 : i32
    return %c0_i32, %c0_i32_0 : i32, i32
  }
  func.func @transform_3(%arg0: i32) -> (i32, i32) {
    %c0_i32 = arith.constant 0 : i32
    %c0_i32_0 = arith.constant 0 : i32
    %c0_i32_1 = arith.constant 0 : i32
    return %c0_i32, %c0_i32_0 : i32, i32
  }
  func.func @transform_4(%arg0: i32) -> (i32, i32) {
    %c0_i32 = arith.constant 0 : i32
    %c0_i32_0 = arith.constant 0 : i32
    %c0_i32_1 = arith.constant 0 : i32
    return %c0_i32, %c0_i32_0 : i32, i32
  }
  func.func @transform_5(%arg0: i32) -> (i32, i32) {
    %c0_i32 = arith.constant 0 : i32
    %c0_i32_0 = arith.constant 0 : i32
    %c0_i32_1 = arith.constant 0 : i32
    return %c0_i32, %c0_i32_0 : i32, i32
  }
  func.func @transform_6(%arg0: i32) -> (i32, i32) {
    %c0_i32 = arith.constant 0 : i32
    %c0_i32_0 = arith.constant 0 : i32
    %c0_i32_1 = arith.constant 0 : i32
    return %c0_i32, %c0_i32_0 : i32, i32
  }
  func.func @transform_7(%arg0: i32) -> (i32, i32) {
    %c0_i32 = arith.constant 0 : i32
    %c0_i32_0 = arith.constant 0 : i32
    return %arg0, %c0_i32 : i32, i32
  }
}

</mosaic_0001>

<bundles_post_ra>
// kernel: dqn2_forward.1
= control target key start
LH: loop header
LB: loop body
LE: loop exit
PB: predicated region body
PF: predicated region fallthrough
CT: control target
= control target key end

     0   :  { %12 = vsyncpa [#allocation3], 0  ;;  %s1350_s0 = inlined_call_operand.vmem [shape: f32[8,32], index: 0, kind: input, shape index: {}]   ;;  %s1351_s1 = inlined_call_operand.vmem [shape: bf16[32,256], index: 1, kind: input, shape index: {}]   ;;  %s1352_s2 = inlined_call_operand.hbm [shape: bf16[256,256], index: 2, kind: input, shape index: {}]   ;;  %s1353_s3 = inlined_call_operand.hbm [shape: bf16[256,256], index: 3, kind: input, shape index: {}]   ;;  %s1354_s4 = inlined_call_operand.vmem [shape: bf16[256,8], index: 4, kind: input, shape index: {}]   ;;  %s1355_s5 = inlined_call_operand.vmem [shape: bf16[3,256], index: 5, kind: input, shape index: {}]   ;;  %s1356_s6 = inlined_call_operand.vmem [shape: f32[1,8], index: 6, kind: input, shape index: {}]   ;;  %s1357_s7 = inlined_call_operand.hbm [shape: f32[8,8], index: 7, kind: output, shape index: {}]  }
   0x1   :  { %13 = vsyncpa [#allocation6], 0 }
   0x2   :  { %14 = vsyncpa [#allocation4], 0  ;;  %s1185_s24 = smov [#allocation2]   ;;  %s1113_s28 = scalar_lea.hbm %s1352_s2, 4096 }
   0x3   :  { %s24_s25 = sshll.u32 %s1185_s24, 4  ;;  %p1114_p0 = scmp.ne.s32.totalorder %s1352_s2, %s1113_s28  ;;  %s25_s25 = int_to_ptr.vmem [resolvable:$true] %s24_s25 }
   0x4   :  { %p1117_p1 = scmp.lt.u32.totalorder %s1113_s28, %s1352_s2 }
   0x6   :  { %p1119_p2 = pnand %p1117_p1, %p1114_p0 }
   0x8   :  { %1122 = shalt.err (!%p1119_p2)
}
   0x9   :  { %s1123_s10 = scalar_lea.vmem %s25_s25, 4096  ;;  %p1128_p4 = scmp.lt.s32.totalorder %s25_s25, %s25_s25 }
   0xa   :  { %p1124_p3 = scmp.ne.s32.totalorder %s25_s25, %s1123_s10  ;;  %p1129_p5 = scmp.lt.s32.totalorder %s1123_s10, %s1123_s10 }
   0xc   :  { %p1130_p6 = por %p1129_p5, %p1128_p4 }
   0xe   :  { %p1131_p7 = pnand %p1130_p6, %p1124_p3 }
  0x10   :  { %1134 = shalt.err (!%p1131_p7)
}
  0x11   :  { %s1186_s11 = smov 128   ;;  %s1187_s12 = smov 8  }
  0x12   :  { %30 = dma.hbm_to_vmem [thread:$0]  %s1352_s2, 4096, %s25_s25, [#allocation3], %s1186_s11, %s1186_s11, %s1187_s12  }
  0x13   :  { %s1188_s15 = smov [#allocation5]   ;;  %s1135_s19 = scalar_lea.hbm %s1353_s3, 4096 }
  0x14   :  { %s36_s16 = sshll.u32 %s1188_s15, 4  ;;  %p1136_p8 = scmp.ne.s32.totalorder %s1353_s3, %s1135_s19  ;;  %s37_s16 = int_to_ptr.vmem [resolvable:$true] %s36_s16 }
  0x15   :  { %p1139_p9 = scmp.lt.u32.totalorder %s1135_s19, %s1353_s3 }
  0x17   :  { %p1141_p10 = pnand %p1139_p9, %p1136_p8 }
  0x19   :  { %1144 = shalt.err (!%p1141_p10)
}
  0x1a   :  { %s1145_s24 = scalar_lea.vmem %s37_s16, 4096  ;;  %p1150_p12 = scmp.lt.s32.totalorder %s37_s16, %s37_s16 }
  0x1b   :  { %p1146_p11 = scmp.ne.s32.totalorder %s37_s16, %s1145_s24  ;;  %p1151_p13 = scmp.lt.s32.totalorder %s1145_s24, %s1145_s24 }
  0x1d   :  { %p1152_p0 = por %p1151_p13, %p1150_p12 }
  0x1f   :  { %p1153_p1 = pnand %p1152_p0, %p1146_p11 }
  0x21   :  { %1156 = shalt.err (!%p1153_p1)
}
  0x22   :  { %42 = dma.hbm_to_vmem [thread:$0]  %s1353_s3, 4096, %s37_s16, [#allocation6], %s1186_s11, %s1186_s11, %s1187_s12  }
  0x23   :  { %1179 = dma.done.wait [#allocation3], 4096  }
  0x24   :  { %1180 = vsyncadd [#allocation3], 4294963200 }
  0x25   :  { %1181 = dma.done.wait [#allocation6], 4096  }
  0x26   :  { %1182 = vsyncadd [#allocation6], 4294963200  ;;  %v1189_v0 = vmov 0   ;;  %v995_v1 = vld [vmem:[%s1351_s1 + $0x4] ss:$8 sps:$4 sm:$0xff]   ;;  %vm82_vm0 = vcmask 261120  }
  0x27   :  { %118 = vmatprep.mubr.bf16.mxu0 %v1189_v0  ;;  %v997_v2 = vld [vmem:[%s1351_s1] ss:$8 sps:$4 sm:$0xff]   ;;  %86 = vmatprep.subr.bf16.mxu0 %v995_v1  ;;  %v998_v3 = vld [vmem:[%s1351_s1 + $0x14] ss:$8 sps:$4 sm:$0xff]   ;;  %v1000_v4 = vld [vmem:[%s1351_s1 + $0x10] ss:$8 sps:$4 sm:$0xff]  }
  0x28   :  { %v56_v5 = vld [vmem:[%s1350_s0] sm:$0xff]  ;;  %87 = vmatpush1.bf16.msra.mxu0 %v997_v2  ;;  %v1004_v8 = vld [vmem:[#allocation2 + $0x14] ss:$8 sps:$4 sm:$0xff]   ;;  %v1006_v10 = vld [vmem:[#allocation2 + $0x10] ss:$8 sps:$4 sm:$0xff]   ;;  %s1190_s19 = smov [#allocation7]  }
  0x29   :  { %v1001_v6 = vld [vmem:[#allocation2 + $0x4] ss:$8 sps:$4 sm:$0xff]   ;;  %88 = vmatprep.subr.bf16.mxu0 %v998_v3  ;;  %v1003_v7 = vld [vmem:[#allocation2] ss:$8 sps:$4 sm:$0xff]   ;;  %v57_v9 = vpack.c.bf16 %v56_v5, %v56_v5  ;;  %v1010_v13 = vld [vmem:[#allocation2 + $0x34] ss:$8 sps:$4 sm:$0xff]  }
  0x2a   :  { %349 = vmatprep.subr.bf16.mxu1 %v1001_v6  ;;  %v1007_v11 = vld [vmem:[#allocation2 + $0x24] ss:$8 sps:$4 sm:$0xff]   ;;  %v1009_v12 = vld [vmem:[#allocation2 + $0x20] ss:$8 sps:$4 sm:$0xff]   ;;  %v1012_v14 = vld [vmem:[#allocation2 + $0x30] ss:$8 sps:$4 sm:$0xff]  }
  0x2b   :  { %350 = vmatpush1.bf16.msra.mxu1 %v1003_v7  ;;  %v1013_v15 = vld [vmem:[#allocation2 + $0x44] ss:$8 sps:$4 sm:$0xff]   ;;  %v1015_v16 = vld [vmem:[#allocation2 + $0x40] ss:$8 sps:$4 sm:$0xff]   ;;  %v1016_v17 = vld [vmem:[#allocation2 + $0x54] ss:$8 sps:$4 sm:$0xff]  }
  0x2c   :  { %89 = vmatpush1.bf16.msra.mxu0 %v1000_v4  ;;  %351 = vmatprep.subr.bf16.mxu1 %v1004_v8  ;;  %v1018_v18 = vld [vmem:[#allocation2 + $0x50] ss:$8 sps:$4 sm:$0xff]   ;;  %v1019_v19 = vld [vmem:[#allocation2 + $0x64] ss:$8 sps:$4 sm:$0xff]   ;;  %v1021_v20 = vld [vmem:[#allocation2 + $0x60] ss:$8 sps:$4 sm:$0xff]   ;;  %v142_v4 = vlaneseq }
  0x2d   :  { %v1022_v21 = vld [vmem:[#allocation2 + $0x74] ss:$8 sps:$4 sm:$0xff]   ;;  %v1024_v22 = vld [vmem:[#allocation2 + $0x70] ss:$8 sps:$4 sm:$0xff]   ;;  %v1025_v23 = vld [vmem:[#allocation2 + $0x84] ss:$8 sps:$4 sm:$0xff]  }
  0x2e   :  { %v1027_v24 = vld [vmem:[#allocation2 + $0x80] ss:$8 sps:$4 sm:$0xff]   ;;  %v1028_v25 = vld [vmem:[#allocation2 + $0x94] ss:$8 sps:$4 sm:$0xff]   ;;  %v1030_v26 = vld [vmem:[#allocation2 + $0x90] ss:$8 sps:$4 sm:$0xff]  }
  0x2f   :  { %882 = vmatmul.mubr.msk.bf16.vlgmr.msra.gmra.mrb[0].mxu0 %vm82_vm0, %v57_v9  ;;  %352 = vmatpush1.bf16.msra.mxu1 %v1006_v10  ;;  %v1031_v27 = vld [vmem:[#allocation2 + $0xa4] ss:$8 sps:$4 sm:$0xff]   ;;  %v1033_v28 = vld [vmem:[#allocation2 + $0xa0] ss:$8 sps:$4 sm:$0xff]   ;;  %v1034_v29 = vld [vmem:[#allocation2 + $0xb4] ss:$8 sps:$4 sm:$0xff]  }
  0x30   :  { %353 = vmatprep.subr.bf16.mxu1 %v1007_v11  ;;  %v1036_v30 = vld [vmem:[#allocation2 + $0xb0] ss:$8 sps:$4 sm:$0xff]   ;;  %v1037_v31 = vld [vmem:[#allocation2 + $0xc4] ss:$8 sps:$4 sm:$0xff]   ;;  %v1039_v32 = vld [vmem:[#allocation2 + $0xc0] ss:$8 sps:$4 sm:$0xff]  }
  0x31   :  { %v1040_v33 = vld [vmem:[#allocation2 + $0xd4] ss:$8 sps:$4 sm:$0xff]   ;;  %v1042_v34 = vld [vmem:[#allocation2 + $0xd0] ss:$8 sps:$4 sm:$0xff]   ;;  %v1043_v35 = vld [vmem:[#allocation2 + $0xe4] ss:$8 sps:$4 sm:$0xff]  }
  0x32   :  { %v1045_v36 = vld [vmem:[#allocation2 + $0xe0] ss:$8 sps:$4 sm:$0xff]   ;;  %v1046_v37 = vld [vmem:[#allocation2 + $0xf4] ss:$8 sps:$4 sm:$0xff]   ;;  %v1048_v38 = vld [vmem:[#allocation2 + $0xf0] ss:$8 sps:$4 sm:$0xff]  }
  0x33   :  { %354 = vmatpush1.bf16.msra.mxu1 %v1009_v12  ;;  %v1049_v39 = vld [vmem:[#allocation5] ss:$8 sps:$4 sm:$0xff]   ;;  %v1051_v40 = vld [vmem:[#allocation5 + $0x4] ss:$8 sps:$4 sm:$0xff]   ;;  %v1054_v41 = vld [vmem:[#allocation5 + $0x14] ss:$8 sps:$4 sm:$0xff]  }
  0x34   :  { %355 = vmatprep.subr.bf16.mxu1 %v1010_v13  ;;  %614 = vmatprep.subr.bf16.mxu0 %v1051_v40  ;;  %v1052_v42 = vld [vmem:[#allocation5 + $0x10] ss:$8 sps:$4 sm:$0xff]   ;;  %v1057_v43 = vld [vmem:[#allocation5 + $0x24] ss:$8 sps:$4 sm:$0xff]   ;;  %v1055_v44 = vld [vmem:[#allocation5 + $0x20] ss:$8 sps:$4 sm:$0xff]  }
  0x35   :  { %615 = vmatpush1.bf16.msra.mxu0 %v1049_v39  ;;  %v1060_v45 = vld [vmem:[#allocation5 + $0x34] ss:$8 sps:$4 sm:$0xff]   ;;  %v1058_v46 = vld [vmem:[#allocation5 + $0x30] ss:$8 sps:$4 sm:$0xff]   ;;  %v1063_v47 = vld [vmem:[#allocation5 + $0x44] ss:$8 sps:$4 sm:$0xff]  }
  0x36   :  { %616 = vmatprep.subr.bf16.mxu0 %v1054_v41  ;;  %v1061_v48 = vld [vmem:[#allocation5 + $0x40] ss:$8 sps:$4 sm:$0xff]   ;;  %v1066_v49 = vld [vmem:[#allocation5 + $0x54] ss:$8 sps:$4 sm:$0xff]   ;;  %v1064_v50 = vld [vmem:[#allocation5 + $0x50] ss:$8 sps:$4 sm:$0xff]  }
  0x37   :  { %356 = vmatpush1.bf16.msra.mxu1 %v1012_v14  ;;  %v1069_v51 = vld [vmem:[#allocation5 + $0x64] ss:$8 sps:$4 sm:$0xff]   ;;  %v1067_v52 = vld [vmem:[#allocation5 + $0x60] ss:$8 sps:$4 sm:$0xff]   ;;  %v1072_v53 = vld [vmem:[#allocation5 + $0x74] ss:$8 sps:$4 sm:$0xff]  }
  0x38   :  { %357 = vmatprep.subr.bf16.mxu1 %v1013_v15  ;;  %v1070_v54 = vld [vmem:[#allocation5 + $0x70] ss:$8 sps:$4 sm:$0xff]   ;;  %v1075_v55 = vld [vmem:[#allocation5 + $0x84] ss:$8 sps:$4 sm:$0xff]   ;;  %v1073_v56 = vld [vmem:[#allocation5 + $0x80] ss:$8 sps:$4 sm:$0xff]  }
  0x39   :  { %617 = vmatpush1.bf16.msra.mxu0 %v1052_v42  ;;  %v1078_v57 = vld [vmem:[#allocation5 + $0x94] ss:$8 sps:$4 sm:$0xff]   ;;  %v1076_v58 = vld [vmem:[#allocation5 + $0x90] ss:$8 sps:$4 sm:$0xff]   ;;  %v1081_v59 = vld [vmem:[#allocation5 + $0xa4] ss:$8 sps:$4 sm:$0xff]  }
  0x3a   :  { %618 = vmatprep.subr.bf16.mxu0 %v1057_v43  ;;  %v1079_v60 = vld [vmem:[#allocation5 + $0xa0] ss:$8 sps:$4 sm:$0xff]   ;;  %v1084_v61 = vld [vmem:[#allocation5 + $0xb4] ss:$8 sps:$4 sm:$0xff]   ;;  %v1082_v62 = vld [vmem:[#allocation5 + $0xb0] ss:$8 sps:$4 sm:$0xff]  }
  0x3b   :  { %358 = vmatpush1.bf16.msra.mxu1 %v1015_v16  ;;  %v1087_v63 = vld [vmem:[#allocation5 + $0xc4] ss:$8 sps:$4 sm:$0xff]   ;;  %v1085_v1 = vld [vmem:[#allocation5 + $0xc0] ss:$8 sps:$4 sm:$0xff]   ;;  %v1090_v2 = vld [vmem:[#allocation5 + $0xd4] ss:$8 sps:$4 sm:$0xff]  }
  0x3c   :  { %359 = vmatprep.subr.bf16.mxu1 %v1016_v17  ;;  %v1088_v3 = vld [vmem:[#allocation5 + $0xd0] ss:$8 sps:$4 sm:$0xff]   ;;  %v883_v5 = vld.sshfl [vmem:[%s1355_s5] sm:$0x11 pattern:$0x76325410] }
  0x3d   :  { %619 = vmatpush1.bf16.msra.mxu0 %v1055_v44  ;;  %v1274_v6 = vshrl.u32 %v142_v4, 7  ;;  %v138_v7 = vcombine.high %v883_v5, %v883_v5  ;;  %v140_v8 = vpack.i.b16 %v883_v5, %v883_v5  ;;  %v403_v39 = vshrl.u32 %v883_v5, 16  ;;  %s868_s20 = sshll.u32 %s1190_s19, 4  ;;  %s869_s20 = int_to_ptr.vmem [resolvable:$true] %s868_s20 }
  0x3e   :  { %620 = vmatprep.subr.bf16.mxu0 %v1060_v45  ;;  %vm860_vm1 = vcmask 64512   ;;  %s1157_s21 = scalar_lea.vmem %s869_s20, 128  ;;  %p1162_p3 = scmp.lt.s32.totalorder %s869_s20, %s869_s20 }
  0x3f   :  { %360 = vmatpush1.bf16.msra.mxu1 %v1018_v18  ;;  %v144_v9 = vsub.s32 0, %v1274_v6  ;;  %v147_v10 = vpack.i.b16 %v138_v7, %v138_v7  ;;  %v411_v40 = vshrl.u32 %v138_v7, 16  ;;  %v404_v41 = vpack.i.b16 %v403_v39, %v403_v39  ;;  %p1158_p2 = scmp.ne.s32.totalorder %s869_s20, %s1157_s21  ;;  %p1163_p4 = scmp.lt.s32.totalorder %s1157_s21, %s1157_s21 }
  0x40   :  { %361 = vmatprep.subr.bf16.mxu1 %v1019_v19 }
  0x41   :  { %621 = vmatpush1.bf16.msra.mxu0 %v1058_v46  ;;  %v145_v11 = vrot.slane %v140_v8, %v144_v9  ;;  %v152_v13 = vrot.slane %v147_v10, %v144_v9  ;;  %v412_v42 = vpack.i.b16 %v411_v40, %v411_v40  ;;  %v409_v43 = vrot.slane %v404_v41, %v144_v9  ;;  %p1164_p5 = por %p1163_p4, %p1162_p3 }
  0x42   :  { %622 = vmatprep.subr.bf16.mxu0 %v1063_v47 }
  0x43   :  { %362 = vmatpush1.bf16.msra.mxu1 %v1021_v20  ;;  %v417_v45 = vrot.slane %v412_v42, %v144_v9  ;;  %p1165_p6 = pnand %p1164_p5, %p1158_p2 }
  0x44   :  { %363 = vmatprep.subr.bf16.mxu1 %v1022_v21 }
  0x45   :  { %623 = vmatpush1.bf16.msra.mxu0 %v1061_v48 }
  0x46   :  { %624 = vmatprep.subr.bf16.mxu0 %v1066_v49 }
  0x47   :  { %364 = vmatpush1.bf16.msra.mxu1 %v1024_v22 }
  0x48   :  { %365 = vmatprep.subr.bf16.mxu1 %v1025_v23  ;;  %v1093_v23 = vld [vmem:[#allocation5 + $0xe4] ss:$8 sps:$4 sm:$0xff]  }
  0x49   :  { %625 = vmatpush1.bf16.msra.mxu0 %v1064_v50 }
  0x4a   :  { %626 = vmatprep.subr.bf16.mxu0 %v1069_v51 }
  0x4b   :  { %366 = vmatpush1.bf16.msra.mxu1 %v1027_v24  ;;  %v1091_v24 = vld [vmem:[#allocation5 + $0xe0] ss:$8 sps:$4 sm:$0xff]  }
  0x4c   :  { %367 = vmatprep.subr.bf16.mxu1 %v1028_v25  ;;  %v1096_v25 = vld [vmem:[#allocation5 + $0xf4] ss:$8 sps:$4 sm:$0xff]  }
  0x4d   :  { %627 = vmatpush1.bf16.msra.mxu0 %v1067_v52 }
  0x4e   :  { %628 = vmatprep.subr.bf16.mxu0 %v1072_v53 }
  0x4f   :  { %368 = vmatpush1.bf16.msra.mxu1 %v1030_v26  ;;  %v1094_v26 = vld [vmem:[#allocation5 + $0xf0] ss:$8 sps:$4 sm:$0xff]  }
  0x50   :  { %369 = vmatprep.subr.bf16.mxu1 %v1031_v27  ;;  %v1097_v27 = vld [vmem:[%s1354_s4 + $0x40] sm:$0xff]  }
  0x51   :  { %629 = vmatpush1.bf16.msra.mxu0 %v1070_v54 }
  0x52   :  { %630 = vmatprep.subr.bf16.mxu0 %v1075_v55  ;;  %v1109_v55 = vld [vmem:[%s1354_s4 + $0x70] sm:$0xff]  }
  0x53   :  { %370 = vmatpush1.bf16.msra.mxu1 %v1033_v28  ;;  %v1098_v28 = vld [vmem:[%s1354_s4] sm:$0xff]  }
  0x54   :  { %371 = vmatprep.subr.bf16.mxu1 %v1034_v29  ;;  %v1099_v29 = vld [vmem:[%s1354_s4 + $0x48] sm:$0xff]  }
  0x55   :  { %631 = vmatpush1.bf16.msra.mxu0 %v1073_v56  ;;  %v1110_v56 = vld [vmem:[%s1354_s4 + $0x30] sm:$0xff]  }
  0x56   :  { %632 = vmatprep.subr.bf16.mxu0 %v1078_v57  ;;  %v1111_v57 = vld [vmem:[%s1354_s4 + $0x78] sm:$0xff]  }
  0x57   :  { %372 = vmatpush1.bf16.msra.mxu1 %v1036_v30  ;;  %v1100_v30 = vld [vmem:[%s1354_s4 + $0x8] sm:$0xff]  }
  0x58   :  { %373 = vmatprep.subr.bf16.mxu1 %v1037_v31  ;;  %v1101_v31 = vld [vmem:[%s1354_s4 + $0x50] sm:$0xff]  }
  0x59   :  { %633 = vmatpush1.bf16.msra.mxu0 %v1076_v58  ;;  %v1112_v58 = vld [vmem:[%s1354_s4 + $0x38] sm:$0xff]  }
  0x5a   :  { %634 = vmatprep.subr.bf16.mxu0 %v1081_v59  ;;  %v949_v59 = vld.sshfl [vmem:[%s1355_s5] sm:$0x22 pattern:$0x76325410] }
  0x5b   :  { %374 = vmatpush1.bf16.msra.mxu1 %v1039_v32  ;;  %v1102_v32 = vld [vmem:[%s1354_s4 + $0x10] sm:$0xff]  }
  0x5c   :  { %375 = vmatprep.subr.bf16.mxu1 %v1040_v33  ;;  %v1103_v33 = vld [vmem:[%s1354_s4 + $0x58] sm:$0xff]  }
  0x5d   :  { %635 = vmatpush1.bf16.msra.mxu0 %v1079_v60  ;;  %v666_v60 = vcombine.high %v949_v59, %v949_v59 }
  0x5e   :  { %636 = vmatprep.subr.bf16.mxu0 %v1084_v61  ;;  %v668_v61 = vpack.i.b16 %v949_v59, %v949_v59 }
  0x5f   :  { %376 = vmatpush1.bf16.msra.mxu1 %v1042_v34  ;;  %v1104_v34 = vld [vmem:[%s1354_s4 + $0x18] sm:$0xff]  }
  0x60   :  { %377 = vmatprep.subr.bf16.mxu1 %v1043_v35  ;;  %v1105_v35 = vld [vmem:[%s1354_s4 + $0x60] sm:$0xff]  }
  0x61   :  { %637 = vmatpush1.bf16.msra.mxu0 %v1082_v62  ;;  %v672_v62 = vsub.s32 1, %v1274_v6  ;;  %v950_v6 = vld [vmem:[%s1356_s6] ss:$0 sm:$0xff] }
  0x62   :  { %638 = vmatprep.subr.bf16.mxu0 %v1087_v63  ;;  %v675_v63 = vpack.i.b16 %v666_v60, %v666_v60 }
  0x63   :  { %378 = vmatpush1.bf16.msra.mxu1 %v1045_v36  ;;  %v1106_v36 = vld [vmem:[%s1354_s4 + $0x20] sm:$0xff]  }
  0x64   :  { %379 = vmatprep.subr.bf16.mxu1 %v1046_v37  ;;  %v1107_v37 = vld [vmem:[%s1354_s4 + $0x68] sm:$0xff]  }
  0x65   :  { %639 = vmatpush1.bf16.msra.mxu0 %v1085_v1  ;;  %v673_v1 = vrot.slane %v668_v61, %v672_v62 }
  0x66   :  { %640 = vmatprep.subr.bf16.mxu0 %v1090_v2 }
  0x67   :  { %380 = vmatpush1.bf16.msra.mxu1 %v1048_v38  ;;  %v1108_v38 = vld [vmem:[%s1354_s4 + $0x28] sm:$0xff]  }
  0x68   :  { %967 = vmatprep.subr.bf16.mxu1 %v1097_v27 }
  0x69   :  { %641 = vmatpush1.bf16.msra.mxu0 %v1088_v3  ;;  %v680_v3 = vrot.slane %v675_v63, %v672_v62 }
  0x6a   :  { %642 = vmatprep.subr.bf16.mxu0 %v1093_v23 }
  0x6d   :  { %643 = vmatpush1.bf16.msra.mxu0 %v1091_v24 }
  0x6e   :  { %644 = vmatprep.subr.bf16.mxu0 %v1096_v25 }
  0x71   :  { %645 = vmatpush1.bf16.msra.mxu0 %v1094_v26 }
 0x102   :  { %v120_v12 = vpop.f32.mrb[0].mxu0 }
 0x103   :  { %v127_v14 = vpack.c.bf16 %v120_v12, %v120_v12  ;;  %v122_v15 = vpop.f32.mrb[1].mxu0 }
 0x104   :  { %v128_v16 = vpack.c.bf16 %v122_v15, %v122_v15  ;;  %v124_v17 = vpop.f32.mrb[2].mxu0 }
 0x105   :  { %v153_v18 = vadd.bf16 %v145_v11, %v127_v14  ;;  %v125_v19 = vpop.f32.mrb[3].mxu0 }
 0x106   :  { %v154_v20 = vadd.bf16 %v152_v13, %v128_v16 }
 0x107   :  { %v155_v22 = vmax.bf16 %v1189_v0, %v153_v18 }
 0x108   :  { %v156_v21 = vmax.bf16 %v1189_v0, %v154_v20 }
 0x10a   :  { %381 = vmatprep.mubr.bf16.mxu1 %v156_v21 }
 0x10b   :  { %382 = vmatmul.mubr.bf16.vlgmr.msra.gmra.mrb[0].mxu1 %v155_v22 }
 0x10c   :  { %968 = vmatpush3.bf16.msra.mxu1 %v1098_v28 }
 0x10d   :  { %969 = vmatprep.subr.bf16.mxu1 %v1099_v29 }
 0x110   :  { %970 = vmatpush3.bf16.msra.mxu1 %v1100_v30 }
 0x111   :  { %971 = vmatprep.subr.bf16.mxu1 %v1101_v31 }
 0x114   :  { %972 = vmatpush3.bf16.msra.mxu1 %v1102_v32 }
 0x115   :  { %973 = vmatprep.subr.bf16.mxu1 %v1103_v33 }
 0x118   :  { %974 = vmatpush3.bf16.msra.mxu1 %v1104_v34 }
 0x119   :  { %975 = vmatprep.subr.bf16.mxu1 %v1105_v35 }
 0x11c   :  { %976 = vmatpush3.bf16.msra.mxu1 %v1106_v36 }
 0x11d   :  { %977 = vmatprep.subr.bf16.mxu1 %v1107_v37 }
 0x120   :  { %978 = vmatpush3.bf16.msra.mxu1 %v1108_v38 }
 0x121   :  { %979 = vmatprep.subr.bf16.mxu1 %v1109_v55 }
 0x124   :  { %980 = vmatpush3.bf16.msra.mxu1 %v1110_v56 }
 0x125   :  { %981 = vmatprep.subr.bf16.mxu1 %v1111_v57 }
 0x128   :  { %982 = vmatpush3.bf16.msra.mxu1 %v1112_v58 }
 0x1de   :  { %v383_v44 = vpop.f32.mrb[0].mxu1 }
 0x1df   :  { %v390_v46 = vpack.c.bf16 %v383_v44, %v383_v44  ;;  %v385_v47 = vpop.f32.mrb[1].mxu1 }
 0x1e0   :  { %v391_v48 = vpack.c.bf16 %v385_v47, %v385_v47  ;;  %v387_v49 = vpop.f32.mrb[2].mxu1 }
 0x1e1   :  { %v418_v50 = vadd.bf16 %v409_v43, %v390_v46  ;;  %v388_v51 = vpop.f32.mrb[3].mxu1 }
 0x1e2   :  { %v419_v52 = vadd.bf16 %v417_v45, %v391_v48 }
 0x1e3   :  { %v420_v54 = vmax.bf16 %v1189_v0, %v418_v50 }
 0x1e4   :  { %v421_v53 = vmax.bf16 %v1189_v0, %v419_v52 }
 0x1e6   :  { %646 = vmatprep.mubr.bf16.mxu0 %v421_v53 }
 0x1e7   :  { %647 = vmatmul.mubr.bf16.vlgmr.msra.gmra.mrb[4].mxu0 %v420_v54 }
 0x2ba   :  { %v648_v2 = vpop.f32.mrb[4].mxu0 }
 0x2bb   :  { %v655_v4 = vpack.c.bf16 %v648_v2, %v648_v2  ;;  %v650_v5 = vpop.f32.mrb[5].mxu0 }
 0x2bc   :  { %v656_v7 = vpack.c.bf16 %v650_v5, %v650_v5  ;;  %v652_v8 = vpop.f32.mrb[6].mxu0 }
 0x2bd   :  { %v681_v9 = vadd.bf16 %v673_v1, %v655_v4  ;;  %v653_v10 = vpop.f32.mrb[7].mxu0 }
 0x2be   :  { %v682_v11 = vadd.bf16 %v680_v3, %v656_v7 }
 0x2bf   :  { %v683_v13 = vmax.bf16 %v1189_v0, %v681_v9 }
 0x2c0   :  { %v684_v12 = vmax.bf16 %v1189_v0, %v682_v11 }
 0x2c2   :  { %852 = vmatprep.mubr.bf16.mxu1 %v684_v12 }
 0x2c3   :  { %853 = vmatmul.mubr.bf16.vlgmr.msra.gmra.mrb[4].mxu1 %v683_v13 }
 0x396   :  { %v983_v14 = vpop.f32.mrb[4].mxu1 }
 0x397   :  { %v984_v15 = vpop.f32.mrb[5].mxu1 }
 0x398   :  { %v985_v16 = vadd.f32 %v984_v15, %v983_v14  ;;  %v986_v17 = vpop.f32.mrb[6].mxu1 }
 0x399   :  { %v987_v18 = vpop.f32.mrb[7].mxu1 }
 0x39a   :  { %v855_v19 = vadd.f32 %v985_v16, %v950_v6 }
 0x39c   :  { %861 = vst.msk [vmem:[#allocation7] sm:$0xff] %vm860_vm1, %v855_v19 }
 0x39d   :  { %1168 = shalt.err (!%p1165_p6)
}
 0x39e   :  { %s1169_s6 = scalar_lea.hbm %s1357_s7, 128 }
 0x39f   :  { %p1170_p7 = scmp.ne.s32.totalorder %s1357_s7, %s1169_s6  ;;  %p1173_p8 = scmp.lt.u32.totalorder %s1169_s6, %s1357_s7 }
 0x3a1   :  { %p1175_p9 = pnand %p1173_p8, %p1170_p7 }
 0x3a3   :  { %1178 = shalt.err (!%p1175_p9)
}
 0x3a4   :  { %871 = dma.vmem_to_hbm [thread:$0]  %s869_s20, 128, %s1357_s7, [#allocation4]  }
 0x3a5   :  { %1183 = dma.done.wait [#allocation4], 128  }
 0x3a6   :  { %1184 = vsyncadd [#allocation4], 4294967168 }
 0x3a7   :  { %875 = vsyncpa [#allocation3], 1 }
 0x3a8   :  { %876 = vsyncpa [#allocation6], 1 }
 0x3a9   :  { %877 = vsyncpa [#allocation4], 1 }

</bundles_post_ra>
